<compile_context>
chip_gen: v7x
topology: tpu7x:2x2x1
jax: 0.10.0
libtpu: 0.0.40
codegen_flags: <defaults>
</compile_context>

<pallas_src>
import math

import jax
import jax.numpy as jnp
from jax.experimental import pallas as pl
from jax.experimental.pallas import tpu as pltpu


# ---------------------------------------------------------------------------
# Tiled GEMM kernels (full-E projections / output projection).
# ---------------------------------------------------------------------------
def _matmul_kernel(x_ref, w_ref, o_ref, acc_ref):
    @pl.when(pl.program_id(2) == 0)
    def _init():
        acc_ref[...] = jnp.zeros_like(acc_ref)

    acc_ref[...] += jnp.dot(x_ref[...], w_ref[...],
                            preferred_element_type=jnp.float32)

    @pl.when(pl.program_id(2) == pl.num_programs(2) - 1)
    def _finalize():
        o_ref[...] = acc_ref[...].astype(o_ref.dtype)


def _matmul_bias_kernel(x_ref, w_ref, b_ref, o_ref, acc_ref):
    @pl.when(pl.program_id(2) == 0)
    def _init():
        acc_ref[...] = jnp.zeros_like(acc_ref)

    acc_ref[...] += jnp.dot(x_ref[...], w_ref[...],
                            preferred_element_type=jnp.float32)

    @pl.when(pl.program_id(2) == pl.num_programs(2) - 1)
    def _finalize():
        o_ref[...] = (acc_ref[...] + b_ref[...]).astype(o_ref.dtype)


def _pick_tile(dim, pref):
    """Largest tile <= pref that divides dim (falls back to the full dim)."""
    t = min(pref, dim)
    while dim % t != 0:
        t //= 2
    return t


def _linear(x, w, bias=None, *, out_dtype, tm=256, tn=256, tk=512):
    """x: [M, K] (bf16), w: [K, N] (bf16), optional bias: [1, N] (f32)."""
    M, K = x.shape
    K2, N = w.shape
    assert K == K2
    tm, tn, tk = _pick_tile(M, tm), _pick_tile(N, tn), _pick_tile(K, tk)
    grid = (M // tm, N // tn, K // tk)

    in_specs = [pl.BlockSpec((tm, tk), lambda i, j, k: (i, k)),
                pl.BlockSpec((tk, tn), lambda i, j, k: (k, j))]
    args = [x, w]
    kernel = _matmul_kernel
    if bias is not None:
        in_specs.append(pl.BlockSpec((1, tn), lambda i, j, k: (0, j)))
        args.append(bias)
        kernel = _matmul_bias_kernel

    flops = 2 * M * N * K
    bytes_accessed = (M * K * x.dtype.itemsize
                      + (N // tn) * K * N * w.dtype.itemsize
                      + M * N * jnp.dtype(out_dtype).itemsize)

    return pl.pallas_call(
        kernel,
        out_shape=jax.ShapeDtypeStruct((M, N), out_dtype),
        grid=grid,
        in_specs=in_specs,
        out_specs=pl.BlockSpec((tm, tn), lambda i, j, k: (i, j)),
        scratch_shapes=[pltpu.VMEM((tm, tn), jnp.float32)],
        compiler_params=pltpu.CompilerParams(
            dimension_semantics=("parallel", "parallel", "arbitrary")),
        cost_estimate=pl.CostEstimate(flops=flops, transcendentals=0,
                                      bytes_accessed=bytes_accessed),
    )(*args)


# ---------------------------------------------------------------------------
# Flash attention kernel: grid (B, H, n_q, n_kv), online softmax over the
# trailing 'arbitrary' KV axis.  Q is pre-scaled; all inputs are bf16.
# ---------------------------------------------------------------------------
def _flash_attn_kernel(q_ref, k_ref, v_ref, o_ref, m_s, l_s, acc_s):
    kv = pl.program_id(3)

    @pl.when(kv == 0)
    def _init():
        m_s[...] = jnp.full_like(m_s, -jnp.inf)
        l_s[...] = jnp.zeros_like(l_s)
        acc_s[...] = jnp.zeros_like(acc_s)

    q = q_ref[0, 0]                                   # [tq, D] bf16 (scaled)
    k = k_ref[0, 0]                                   # [tk, D] bf16
    v = v_ref[0, 0]                                   # [tk, D] bf16

    # Scores: contract the head dim of both operands (no explicit transpose).
    s = jax.lax.dot_general(q, k, (((1,), (1,)), ((), ())),
                            preferred_element_type=jnp.float32)  # [tq, tk]

    # Online softmax update (statistics kept in f32).
    m_prev = m_s[...]
    m_new = jnp.maximum(m_prev, jnp.max(s, axis=-1, keepdims=True))
    alpha = jnp.exp(m_prev - m_new)
    p = jnp.exp(s - m_new)
    l_s[...] = alpha * l_s[...] + jnp.sum(p, axis=-1, keepdims=True)
    acc_s[...] = alpha * acc_s[...] + jnp.dot(p.astype(jnp.bfloat16), v,
                                              preferred_element_type=jnp.float32)
    m_s[...] = m_new

    @pl.when(kv == pl.num_programs(3) - 1)
    def _finalize():
        o_ref[0, 0] = (acc_s[...] * pl.reciprocal(l_s[...], approx=True)
                       ).astype(o_ref.dtype)


def _flash_attention(qh, kh, vh, *, q_tile=256, kv_tile=256):
    """qh/kh/vh: bf16 [B, H, S, D] (head-major). Returns bf16 [B, H, S, D]."""
    B, H, S, D = qh.shape
    tq = _pick_tile(S, q_tile)
    tk = _pick_tile(S, kv_tile)
    n_q, n_kv = S // tq, S // tk
    grid = (B, H, n_q, n_kv)

    q_spec = pl.BlockSpec((1, 1, tq, D), lambda b, h, qi, ki: (b, h, qi, 0))
    kv_spec = pl.BlockSpec((1, 1, tk, D), lambda b, h, qi, ki: (b, h, ki, 0))
    o_spec = pl.BlockSpec((1, 1, tq, D), lambda b, h, qi, ki: (b, h, qi, 0))

    isz = qh.dtype.itemsize
    flops = 4 * B * H * S * S * D                       # QK^T + PV
    transcendentals = B * H * S * S                     # exp
    bytes_accessed = (qh.size * isz                     # Q read once
                      + n_q * (kh.size + vh.size) * isz # K/V re-read per Q tile
                      + qh.size * isz)                  # context write

    return pl.pallas_call(
        _flash_attn_kernel,
        out_shape=jax.ShapeDtypeStruct((B, H, S, D), jnp.bfloat16),
        grid=grid,
        in_specs=[q_spec, kv_spec, kv_spec],
        out_specs=o_spec,
        scratch_shapes=[
            pltpu.VMEM((tq, 1), jnp.float32),   # running max
            pltpu.VMEM((tq, 1), jnp.float32),   # running sum
            pltpu.VMEM((tq, D), jnp.float32),   # context accumulator
        ],
        compiler_params=pltpu.CompilerParams(
            dimension_semantics=("parallel", "parallel", "parallel",
                                 "arbitrary")),
        cost_estimate=pl.CostEstimate(flops=flops,
                                      transcendentals=transcendentals,
                                      bytes_accessed=bytes_accessed),
    )(qh, kh, vh)


# ---------------------------------------------------------------------------
# Full forward pass: projections (Pallas GEMM) -> flash attention (Pallas)
# -> output projection (Pallas GEMM + bias).
# ---------------------------------------------------------------------------
def mha_forward(q, k, v, wq_t, wk_t, wv_t, wo_t, bo, num_heads,
                *, q_tile=256, kv_tile=256):
    """q, k, v: [B, S, E]; w*_t: [E, E] (in x out, i.e. PyTorch W.T); bo: [E]."""
    B, S, E = q.shape
    assert E % num_heads == 0, "embed_dim must be divisible by num_heads"
    H = num_heads
    D = E // H

    # bf16 activations & weights (halves DMA; MXU operands are bf16 anyway).
    q2 = q.reshape(B * S, E).astype(jnp.bfloat16)
    k2 = k.reshape(B * S, E).astype(jnp.bfloat16)
    v2 = v.reshape(B * S, E).astype(jnp.bfloat16)
    # Fold 1/sqrt(D) into W_q so the attention kernel never rescales.
    wq_b = (wq_t * (1.0 / math.sqrt(D))).astype(jnp.bfloat16)
    wk_b = wk_t.astype(jnp.bfloat16)
    wv_b = wv_t.astype(jnp.bfloat16)
    wo_b = wo_t.astype(jnp.bfloat16)
    bo2 = bo.reshape(1, E).astype(jnp.float32)

    # Hoisted projections: one full-E GEMM each (once per sequence, not once
    # per KV tile per Q tile as in the previous in-kernel version).
    qp = _linear(q2, wq_b, out_dtype=jnp.bfloat16)       # [B*S, E]
    kp = _linear(k2, wk_b, out_dtype=jnp.bfloat16)
    vp = _linear(v2, wv_b, out_dtype=jnp.bfloat16)

    # Head-major [B, H, S, D] so each flash program DMAs a contiguous [tile, D]
    # slab (cheap XLA layout pass over bf16 activations).
    def to_heads(x):
        return x.reshape(B, S, H, D).transpose(0, 2, 1, 3)

    ctx = _flash_attention(to_heads(qp), to_heads(kp), to_heads(vp),
                           q_tile=q_tile, kv_tile=kv_tile)   # [B, H, S, D]

    # Lane-dense [B*S, E] context -> single full-E output projection (+ bias).
    ctx2 = ctx.transpose(0, 2, 1, 3).reshape(B * S, E)
    out = _linear(ctx2, wo_b, bias=bo2, out_dtype=q.dtype)
    return out.reshape(B, S, E)


def mha_reference(q, k, v, wq_t, wk_t, wv_t, wo_t, bo, num_heads):
    """Pure-JAX f32 reference matching torch semantics (eval, no mask)."""
    B, S, E = q.shape
    D = E // num_heads
    qp = (q @ wq_t).reshape(B, S, num_heads, D).transpose(0, 2, 1, 3)
    kp = (k @ wk_t).reshape(B, S, num_heads, D).transpose(0, 2, 1, 3)
    vp = (v @ wv_t).reshape(B, S, num_heads, D).transpose(0, 2, 1, 3)
    s = jnp.einsum("bhqd,bhkd->bhqk", qp, kp) / math.sqrt(D)
    p = jax.nn.softmax(s, axis=-1)
    ctx = jnp.einsum("bhqk,bhkd->bhqd", p, vp)
    ctx = ctx.transpose(0, 2, 1, 3).reshape(B, S, E)
    return ctx @ wo_t + bo.reshape(1, E)


if __name__ == "__main__":
    B, S, E, H = 2, 8, 32, 4  # batch, seq, embed_dim, num_heads

    key = jax.random.PRNGKey(0)
    kq, kk, kvk, kwq, kwk, kwv, kwo, kbo = jax.random.split(key, 8)

    q = jax.random.normal(kq, (B, S, E), dtype=jnp.float32)
    k = jax.random.normal(kk, (B, S, E), dtype=jnp.float32)
    v = jax.random.normal(kvk, (B, S, E), dtype=jnp.float32)

    # nn.Linear(E, E) weights are [out, in] in PyTorch; we store W.T = [in, out].
    wscale = 1.0 / math.sqrt(E)
    wq_t = (jax.random.uniform(kwq, (E, E), minval=-1.0, maxval=1.0) * wscale).astype(jnp.float32)
    wk_t = (jax.random.uniform(kwk, (E, E), minval=-1.0, maxval=1.0) * wscale).astype(jnp.float32)
    wv_t = (jax.random.uniform(kwv, (E, E), minval=-1.0, maxval=1.0) * wscale).astype(jnp.float32)
    wo_t = (jax.random.uniform(kwo, (E, E), minval=-1.0, maxval=1.0) * wscale).astype(jnp.float32)
    bo = (jax.random.uniform(kbo, (E,), minval=-1.0, maxval=1.0) * wscale).astype(jnp.float32)

    out = mha_forward(q, k, v, wq_t, wk_t, wv_t, wo_t, bo, num_heads=H)
    out = jax.block_until_ready(out)

    ref = mha_reference(q, k, v, wq_t, wk_t, wv_t, wo_t, bo, num_heads=H)
    assert out.shape == (B, S, E)
    # bf16 MXU operands (f32 accumulation) -> looser tolerance than pure f32.
    assert jnp.allclose(out, ref, atol=5e-2, rtol=5e-2), "mismatch vs reference"

    print("KERNEL_OK")
</pallas_src>

<mosaic_0001>
module attributes {stable_mosaic.version = 11 : i64} {
  func.func @_matmul_kernel(%arg0: i32, %arg1: i32, %arg2: i32, %arg3: memref<16x32xbf16, #tpu.memory_space<vmem>>, %arg4: memref<32x32xbf16, #tpu.memory_space<vmem>>, %arg5: memref<16x32xbf16, #tpu.memory_space<vmem>>, %arg6: memref<16x32xf32, #tpu.memory_space<vmem>>) attributes {dimension_semantics = [#tpu.dimension_semantics<parallel>, #tpu.dimension_semantics<parallel>, #tpu.dimension_semantics<arbitrary>], iteration_bounds = array<i64: 1, 1, 1>, scalar_prefetch = 0 : i64, scratch_operands = 1 : i64, tpu.core_type = #tpu.core_type<tc>, window_params = [{transform_indices = @transform_0, window_bounds = array<i64: 16, 32>}, {transform_indices = @transform_1, window_bounds = array<i64: 32, 32>}, {transform_indices = @transform_2, window_bounds = array<i64: 16, 32>}]} {
    %c0_i32 = arith.constant 0 : i32
    %0 = arith.cmpi eq, %arg2, %c0_i32 : i32
    %1 = arith.extui %0 : i1 to i32
    %c0_i32_0 = arith.constant 0 : i32
    %2 = arith.cmpi ne, %1, %c0_i32_0 : i32
    scf.if %2 {
      %cst_10 = arith.constant 0.000000e+00 : f32
      %12 = vector.broadcast %cst_10 : f32 to vector<16x32xf32>
      %c0_11 = arith.constant 0 : index
      %c0_12 = arith.constant 0 : index
      %13 = vector.load %arg6[%c0_11, %c0_12] : memref<16x32xf32, #tpu.memory_space<vmem>>, vector<16x32xf32>
      tpu.vector_store %arg6[%c0_11, %c0_12], %12 {strides = array<i32>} : memref<16x32xf32, #tpu.memory_space<vmem>>, vector<16x32xf32>,
    } else {
    }
    %c0 = arith.constant 0 : index
    %c0_1 = arith.constant 0 : index
    %3 = vector.load %arg6[%c0, %c0_1] : memref<16x32xf32, #tpu.memory_space<vmem>>, vector<16x32xf32>
    %c0_2 = arith.constant 0 : index
    %c0_3 = arith.constant 0 : index
    %4 = vector.load %arg3[%c0_2, %c0_3] : memref<16x32xbf16, #tpu.memory_space<vmem>>, vector<16x32xbf16>
    %c0_4 = arith.constant 0 : index
    %c0_5 = arith.constant 0 : index
    %5 = vector.load %arg4[%c0_4, %c0_5] : memref<32x32xbf16, #tpu.memory_space<vmem>>, vector<32x32xbf16>
    %cst = arith.constant dense<0.000000e+00> : vector<16x32xf32>
    %6 = tpu.matmul %4, %5, %cst {dimension_numbers = #tpu.dot_dimension_numbers<[1], [0], [0], [1], [0, 0, 1, 1], [], []>} : vector<16x32xbf16>, vector<32x32xbf16>, vector<16x32xf32> -> vector<16x32xf32>
    %7 = arith.addf %3, %6 : vector<16x32xf32>
    %c0_6 = arith.constant 0 : index
    %c0_7 = arith.constant 0 : index
    %8 = vector.load %arg6[%c0_6, %c0_7] : memref<16x32xf32, #tpu.memory_space<vmem>>, vector<16x32xf32>
    tpu.vector_store %arg6[%c0_6, %c0_7], %7 {strides = array<i32>} : memref<16x32xf32, #tpu.memory_space<vmem>>, vector<16x32xf32>,
    %c0_i32_8 = arith.constant 0 : i32
    %9 = arith.cmpi eq, %arg2, %c0_i32_8 : i32
    %10 = arith.extui %9 : i1 to i32
    %c0_i32_9 = arith.constant 0 : i32
    %11 = arith.cmpi ne, %10, %c0_i32_9 : i32
    scf.if %11 {
      %c0_10 = arith.constant 0 : index
      %c0_11 = arith.constant 0 : index
      %12 = vector.load %arg6[%c0_10, %c0_11] : memref<16x32xf32, #tpu.memory_space<vmem>>, vector<16x32xf32>
      %13 = arith.truncf %12 : vector<16x32xf32> to vector<16x32xbf16>
      %c0_12 = arith.constant 0 : index
      %c0_13 = arith.constant 0 : index
      %14 = vector.load %arg5[%c0_12, %c0_13] : memref<16x32xbf16, #tpu.memory_space<vmem>>, vector<16x32xbf16>
      tpu.vector_store %arg5[%c0_12, %c0_13], %13 {strides = array<i32>} : memref<16x32xbf16, #tpu.memory_space<vmem>>, vector<16x32xbf16>,
    } else {
    }
    return
  }
  func.func @transform_0(%arg0: i32, %arg1: i32, %arg2: i32) -> (i32, i32) {
    %c0_i32 = arith.constant 0 : i32
    return %arg0, %arg2 : i32, i32
  }
  func.func @transform_1(%arg0: i32, %arg1: i32, %arg2: i32) -> (i32, i32) {
    %c0_i32 = arith.constant 0 : i32
    return %arg2, %arg1 : i32, i32
  }
  func.func @transform_2(%arg0: i32, %arg1: i32, %arg2: i32) -> (i32, i32) {
    %c0_i32 = arith.constant 0 : i32
    return %arg0, %arg1 : i32, i32
  }
}

</mosaic_0001>

<bundles_post_ra>
// kernel: tpu_custom_call.1
= control target key start
LH: loop header
LB: loop body
LE: loop exit
PB: predicated region body
PF: predicated region fallthrough
CT: control target
= control target key end

     0   :  { %7 = vsyncpa [#allocation4], 0  ;;  %s329_s0 = inlined_call_operand.hbm [shape: bf16[16,32], index: 0, kind: input, shape index: {}]   ;;  %s330_s1 = inlined_call_operand.hbm [shape: bf16[32,32], index: 1, kind: input, shape index: {}]   ;;  %s331_s2 = inlined_call_operand.hbm [shape: bf16[16,32], index: 2, kind: output, shape index: {}]  }
   0x1   :  { %8 = vsyncpa [#allocation7], 0 }
   0x2   :  { %9 = vsyncpa [#allocation5], 0  ;;  %s257_s9 = smov [#allocation3]   ;;  %s185_s13 = scalar_lea.hbm %s329_s0, 128 }
   0x3   :  { %s15_s10 = sshll.u32 %s257_s9, 4  ;;  %p186_p0 = scmp.ne.s32.totalorder %s329_s0, %s185_s13  ;;  %s16_s10 = int_to_ptr.vmem [resolvable:$true] %s15_s10 }
   0x4   :  { %p189_p1 = scmp.lt.u32.totalorder %s185_s13, %s329_s0 }
   0x6   :  { %p191_p2 = pnand %p189_p1, %p186_p0 }
   0x8   :  { %194 = shalt.err (!%p191_p2)
}
   0x9   :  { %s195_s18 = scalar_lea.vmem %s16_s10, 128  ;;  %p200_p4 = scmp.lt.s32.totalorder %s16_s10, %s16_s10 }
   0xa   :  { %p196_p3 = scmp.ne.s32.totalorder %s16_s10, %s195_s18  ;;  %p201_p5 = scmp.lt.s32.totalorder %s195_s18, %s195_s18 }
   0xc   :  { %p202_p6 = por %p201_p5, %p200_p4 }
   0xe   :  { %p203_p7 = pnand %p202_p6, %p196_p3 }
  0x10   :  { %206 = shalt.err (!%p203_p7)
}
  0x11   :  { %s258_s19 = smov 64   ;;  %s259_s20 = smov 4  }
  0x12   :  { %21 = dma.hbm_to_vmem [thread:$0]  %s329_s0, 128, %s16_s10, [#allocation4], %s258_s19, %s258_s19, %s259_s20  }
  0x13   :  { %s260_s23 = smov [#allocation6]   ;;  %s207_s27 = scalar_lea.hbm %s330_s1, 256 }
  0x14   :  { %s27_s24 = sshll.u32 %s260_s23, 4  ;;  %p208_p8 = scmp.ne.s32.totalorder %s330_s1, %s207_s27  ;;  %s28_s24 = int_to_ptr.vmem [resolvable:$true] %s27_s24 }
  0x15   :  { %p211_p9 = scmp.lt.u32.totalorder %s207_s27, %s330_s1 }
  0x17   :  { %p213_p10 = pnand %p211_p9, %p208_p8 }
  0x19   :  { %216 = shalt.err (!%p213_p10)
}
  0x1a   :  { %s217_s4 = scalar_lea.vmem %s28_s24, 256  ;;  %p222_p12 = scmp.lt.s32.totalorder %s28_s24, %s28_s24 }
  0x1b   :  { %p218_p11 = scmp.ne.s32.totalorder %s28_s24, %s217_s4  ;;  %p223_p13 = scmp.lt.s32.totalorder %s217_s4, %s217_s4 }
  0x1d   :  { %p224_p0 = por %p223_p13, %p222_p12 }
  0x1f   :  { %p225_p1 = pnand %p224_p0, %p218_p11 }
  0x21   :  { %228 = shalt.err (!%p225_p1)
}
  0x22   :  { %33 = dma.hbm_to_vmem [thread:$0]  %s330_s1, 256, %s28_s24, [#allocation7], %s258_s19, %s258_s19, %s259_s20  }
  0x23   :  { %251 = dma.done.wait [#allocation4], 128  }
  0x24   :  { %252 = vsyncadd [#allocation4], 4294967168 }
  0x25   :  { %253 = dma.done.wait [#allocation7], 256  }
  0x26   :  { %254 = vsyncadd [#allocation7], 4294967040  ;;  %vm45_vm0 = vcmask 261120   ;;  %v261_v0 = vmov 0.0   ;;  %vm262_vm1 = vmmov 0   ;;  %v182_v1 = vld [vmem:[#allocation6] sm:$0xff]  }
  0x27   :  { %167 = vmatprep.subr.bf16.mxu0 %v261_v0  ;;  %171 = vmatprep.mubr.msk.bf16.mxu0 %vm262_vm1, %v261_v0  ;;  %46 = vst.msk [vmem:[#allocation2] sm:$0xff] %vm45_vm0, %v261_v0  ;;  %47 = vst.msk [vmem:[#allocation2 + $0x8] sm:$0xff] %vm45_vm0, %v261_v0  ;;  %v183_v2 = vld [vmem:[#allocation6 + $0x8] sm:$0xff]   ;;  %v184_v3 = vld [vmem:[#allocation3] sm:$0xff]   ;;  %vm135_vm2 = vcmask 257024   ;;  %s263_s1 = smov [#allocation8]  }
  0x28   :  { %168 = vmatpush3.bf16.msra.mxu0 %v182_v1  ;;  %s143_s6 = sshll.u32 %s263_s1, 4  ;;  %s144_s6 = int_to_ptr.vmem [resolvable:$true] %s143_s6 }
  0x29   :  { %169 = vmatprep.subr.bf16.mxu0 %v261_v0  ;;  %s229_s7 = scalar_lea.vmem %s144_s6, 128  ;;  %p234_p3 = scmp.lt.s32.totalorder %s144_s6, %s144_s6 }
  0x2a   :  { %p230_p2 = scmp.ne.s32.totalorder %s144_s6, %s229_s7  ;;  %p235_p4 = scmp.lt.s32.totalorder %s229_s7, %s229_s7 }
  0x2c   :  { %170 = vmatpush3.bf16.msra.mxu0 %v183_v2  ;;  %p236_p5 = por %p235_p4, %p234_p3 }
  0x2e   :  { %v48_v4 = vld [vmem:[#allocation2] sm:$0xff]  ;;  %v49_v6 = vld [vmem:[#allocation2 + $0x8] sm:$0xff]  ;;  %p237_p6 = pnand %p236_p5, %p230_p2 }
  0x2f   :  { %172 = vmatmul.mubr.msk.bf16.vlgmr.msra.gmra.mrb[0].mxu0 %vm45_vm0, %v184_v3 }
 0x102   :  { %v111_v5 = vpop.f32.mrb[0].mxu0 }
 0x103   :  { %v118_v7 = vadd.f32 %v111_v5, %v48_v4  ;;  %v173_v8 = vpop.f32.mrb[1].mxu0 }
 0x104   :  { %v114_v9 = vpop.f32.mrb[2].mxu0 }
 0x105   :  { %120 = vst.msk [vmem:[#allocation2] sm:$0xff] %vm45_vm0, %v118_v7  ;;  %v119_v10 = vadd.f32 %v114_v9, %v49_v6  ;;  %v174_v11 = vpop.f32.mrb[3].mxu0 }
 0x107   :  { %121 = vst.msk [vmem:[#allocation2 + $0x8] sm:$0xff] %vm45_vm0, %v119_v10 }
 0x10c   :  { %v125_v12 = vld [vmem:[#allocation2] sm:$0xff] }
 0x10d   :  { %v162_v13 = vpack.c.bf16 %v125_v12, %v125_v12 }
 0x10e   :  { %v126_v14 = vld [vmem:[#allocation2 + $0x8] sm:$0xff] }
 0x10f   :  { %v163_v15 = vpack.c.bf16 %v126_v14, %v126_v14  ;;  %136 = vst.msk [vmem:[#allocation8] sm:$0xf] %vm135_vm2, %v162_v13 }
 0x111   :  { %137 = vst.msk [vmem:[#allocation8 + $0x4] sm:$0xf] %vm135_vm2, %v163_v15 }
 0x112   :  { %240 = shalt.err (!%p237_p6)
}
 0x113   :  { %s241_s10 = scalar_lea.hbm %s331_s2, 128 }
 0x114   :  { %p242_p7 = scmp.ne.s32.totalorder %s331_s2, %s241_s10  ;;  %p245_p8 = scmp.lt.u32.totalorder %s241_s10, %s331_s2 }
 0x116   :  { %p247_p9 = pnand %p245_p8, %p242_p7 }
 0x118   :  { %250 = shalt.err (!%p247_p9)
}
 0x119   :  { %149 = dma.vmem_to_hbm [thread:$0]  %s144_s6, 128, %s331_s2, [#allocation5], %s258_s19, %s258_s19, %s259_s20  }
 0x11a   :  { %255 = dma.done.wait [#allocation5], 128  }
 0x11b   :  { %256 = vsyncadd [#allocation5], 4294967168 }
 0x11c   :  { %153 = vsyncpa [#allocation4], 1 }
 0x11d   :  { %154 = vsyncpa [#allocation7], 1 }
 0x11e   :  { %155 = vsyncpa [#allocation5], 1 }

</bundles_post_ra>
